<compile_context>
chip_gen: v6e
topology: v6e:2x2x1
jax: 0.10.0
libtpu: 0.0.40
codegen_flags: <defaults>
</compile_context>

<pallas_src>
import jax
import jax.numpy as jnp
from jax.experimental import pallas as pl
from jax.experimental.pallas import tpu as pltpu

# Module hyperparameters (from __init__ defaults).
S1 = -50.0
S2 = 50.0
S = 1.0
THRESHOLD = 20.0

_LANE_CHOICES = (1024, 512, 256, 128)
_TARGET_BLOCK_BYTES = 4 * 1024 * 1024  # ~4 MiB per buffer (v7x-safe)


def _softplus(z, beta, threshold):
    """PyTorch-style softplus; exp arg clamped so the soft branch never infs."""
    if beta == 1.0:  # trace-time constant fold (S == 1.0 by default)
        bz = z
        soft = jnp.log1p(jnp.exp(jnp.minimum(bz, threshold)))
    else:
        inv_beta = 1.0 / beta
        bz = z * beta
        soft = jnp.log1p(jnp.exp(jnp.minimum(bz, threshold))) * inv_beta
    return jnp.where(bz > threshold, z, soft)


def _gsc_kernel(x_ref, o_ref):
    x = x_ref[...].astype(jnp.float32)
    # NOTE: on v5e the single EUP slot (2x exp + 2x log1p per element) can be
    # the binding unit; a combined-log rewrite would trim one transcendental.
    # On v6e/v7x this path is HBM-bound and the rewrite is a no-op.
    term1 = _softplus(x - S1, S, THRESHOLD)
    term2 = _softplus(x - S2, S, THRESHOLD)
    o_ref[...] = (term1 - term2 + S1).astype(o_ref.dtype)


def generalized_soft_clipping(x):
    """Apply generalized soft clipping elementwise. x: any shape, float dtype."""
    orig_shape = x.shape
    orig_dtype = x.dtype
    total = x.size
    itemsize = jnp.dtype(orig_dtype).itemsize

    # Pick the widest lane count that divides the element count (no padding
    # needed in that case).  Fall back to 128 lanes + minimal pad otherwise.
    lanes = None
    for cand in _LANE_CHOICES:
        if total % cand == 0:
            lanes = cand
            break
    x_flat = jnp.ravel(x)
    if lanes is None:
        lanes = 128
        padded_total = pl.cdiv(total, lanes) * lanes
        x_flat = jnp.pad(x_flat, (0, padded_total - total))
    else:
        padded_total = total
    rows = padded_total // lanes
    x2d = x_flat.reshape(rows, lanes)

    # Block row count: ~4 MiB per buffer, multiple of 8 (or the full extent).
    tr = max(8, (_TARGET_BLOCK_BYTES // (lanes * itemsize)) // 8 * 8)
    if tr >= rows:
        tr = rows  # single block covering the full row extent
    grid = (pl.cdiv(rows, tr),)  # remainder block (if any) is masked by Pallas

    out2d = pl.pallas_call(
        _gsc_kernel,
        out_shape=jax.ShapeDtypeStruct((rows, lanes), orig_dtype),
        grid_spec=pltpu.PrefetchScalarGridSpec(
            num_scalar_prefetch=0,
            grid=grid,
            in_specs=[pl.BlockSpec((tr, lanes), lambda i: (i, 0))],
            out_specs=pl.BlockSpec((tr, lanes), lambda i: (i, 0)),
        ),
        compiler_params=pltpu.CompilerParams(
            dimension_semantics=("parallel",),
            # Double-buffered in + out at ~4 MiB each needs >16 MiB scoped
            # VMEM (v5e default is 16 MiB); 48 MiB is safe on all generations.
            vmem_limit_bytes=48 * 1024 * 1024,
        ),
    )(x2d)

    if padded_total != total:
        out_flat = out2d.reshape(padded_total)[:total]
    else:
        out_flat = out2d.reshape(total)
    return out_flat.reshape(orig_shape)


def _reference(x):
    # Pure-JAX reference for correctness checking.
    xf = x.astype(jnp.float32)
    t1 = _softplus(xf - S1, S, THRESHOLD)
    t2 = _softplus(xf - S2, S, THRESHOLD)
    return (t1 - t2 + S1).astype(x.dtype)


if __name__ == "__main__":
    key = jax.random.PRNGKey(0)

    # Small NCHW input consistent with a conv-style activation; scale by 60 so
    # both the linear and soft branches of softplus are exercised.
    x = jax.random.normal(key, (2, 4, 16, 16), dtype=jnp.float32) * 60.0
    out = jax.block_until_ready(generalized_soft_clipping(x))
    ref = _reference(x)
    assert out.shape == x.shape and out.dtype == x.dtype
    assert jnp.allclose(out, ref, atol=1e-4, rtol=1e-4), "mismatch vs reference"

    # Awkward shape (element count not a multiple of 128) to exercise the
    # fallback pad path.
    x2 = jax.random.normal(jax.random.PRNGKey(1), (3, 5, 7, 11), dtype=jnp.float32) * 60.0
    out2 = jax.block_until_ready(generalized_soft_clipping(x2))
    ref2 = _reference(x2)
    assert out2.shape == x2.shape and out2.dtype == x2.dtype
    assert jnp.allclose(out2, ref2, atol=1e-4, rtol=1e-4), "mismatch vs reference (odd shape)"

    print("KERNEL_OK")
</pallas_src>

<mosaic_0001>
module attributes {stable_mosaic.version = 11 : i64} {
  func.func @_gsc_kernel(%arg0: i32, %arg1: memref<2x1024xf32, #tpu.memory_space<vmem>>, %arg2: memref<2x1024xf32, #tpu.memory_space<vmem>>) attributes {dimension_semantics = [#tpu.dimension_semantics<parallel>], iteration_bounds = array<i64: 1>, scalar_prefetch = 0 : i64, scratch_operands = 0 : i64, tpu.core_type = #tpu.core_type<tc>, window_params = [{transform_indices = @transform_0, window_bounds = array<i64: 2, 1024>}, {transform_indices = @transform_1, window_bounds = array<i64: 2, 1024>}]} {
    %c0 = arith.constant 0 : index
    %c0_0 = arith.constant 0 : index
    %0 = vector.load %arg1[%c0, %c0_0] : memref<2x1024xf32, #tpu.memory_space<vmem>>, vector<2x1024xf32>
    %cst = arith.constant -5.000000e+01 : f32
    %1 = vector.broadcast %cst : f32 to vector<2x1024xf32>
    %2 = arith.subf %0, %1 : vector<2x1024xf32>
    %cst_1 = arith.constant 2.000000e+01 : f32
    %3 = vector.broadcast %cst_1 : f32 to vector<2x1024xf32>
    %4 = arith.minimumf %2, %3 : vector<2x1024xf32>
    %5 = math.exp %4 : vector<2x1024xf32>
    %6 = math.log1p %5 : vector<2x1024xf32>
    %cst_2 = arith.constant 2.000000e+01 : f32
    %7 = vector.broadcast %cst_2 : f32 to vector<2x1024xf32>
    %8 = arith.cmpf ogt, %2, %7 : vector<2x1024xf32>
    %9 = arith.select %8, %2, %6 : vector<2x1024xi1>, vector<2x1024xf32>
    %cst_3 = arith.constant 5.000000e+01 : f32
    %10 = vector.broadcast %cst_3 : f32 to vector<2x1024xf32>
    %11 = arith.subf %0, %10 : vector<2x1024xf32>
    %cst_4 = arith.constant 2.000000e+01 : f32
    %12 = vector.broadcast %cst_4 : f32 to vector<2x1024xf32>
    %13 = arith.minimumf %11, %12 : vector<2x1024xf32>
    %14 = math.exp %13 : vector<2x1024xf32>
    %15 = math.log1p %14 : vector<2x1024xf32>
    %cst_5 = arith.constant 2.000000e+01 : f32
    %16 = vector.broadcast %cst_5 : f32 to vector<2x1024xf32>
    %17 = arith.cmpf ogt, %11, %16 : vector<2x1024xf32>
    %18 = arith.select %17, %11, %15 : vector<2x1024xi1>, vector<2x1024xf32>
    %19 = arith.subf %9, %18 : vector<2x1024xf32>
    %cst_6 = arith.constant -5.000000e+01 : f32
    %20 = vector.broadcast %cst_6 : f32 to vector<2x1024xf32>
    %21 = arith.addf %19, %20 : vector<2x1024xf32>
    %c0_7 = arith.constant 0 : index
    %c0_8 = arith.constant 0 : index
    %22 = vector.load %arg2[%c0_7, %c0_8] : memref<2x1024xf32, #tpu.memory_space<vmem>>, vector<2x1024xf32>
    tpu.vector_store %arg2[%c0_7, %c0_8], %21 {strides = array<i32>} : memref<2x1024xf32, #tpu.memory_space<vmem>>, vector<2x1024xf32>,
    return
  }
  func.func @transform_0(%arg0: i32) -> (i32, i32) {
    %c0_i32 = arith.constant 0 : i32
    %c0_i32_0 = arith.constant 0 : i32
    return %arg0, %c0_i32 : i32, i32
  }
  func.func @transform_1(%arg0: i32) -> (i32, i32) {
    %c0_i32 = arith.constant 0 : i32
    %c0_i32_0 = arith.constant 0 : i32
    return %arg0, %c0_i32 : i32, i32
  }
}

</mosaic_0001>

<bundles_post_ra>
// kernel: tpu_custom_call.1
= control target key start
LH: loop header
LB: loop body
LE: loop exit
PB: predicated region body
PF: predicated region fallthrough
CT: control target
= control target key end

     0   :  { %6 = vsyncpa [#allocation3], 0  ;;  %s204_s0 = inlined_call_operand.hbm [shape: f32[2,1024], index: 0, kind: input, shape index: {}]   ;;  %s205_s1 = inlined_call_operand.hbm [shape: f32[2,1024], index: 1, kind: output, shape index: {}]  }
   0x1   :  { %7 = vsyncpa [#allocation4], 0  ;;  %s170_s6 = smov [#allocation2]  }
   0x2   :  { %s14_s7 = sshll.u32 %s170_s6, 4  ;;  %s15_s7 = int_to_ptr.vmem [resolvable:$true] %s14_s7 }
   0x3   :  { %s134_s8 = scalar_lea.vmem %s15_s7, 256  ;;  %p139_p1 = scmp.lt.s32.totalorder %s15_s7, %s15_s7 }
   0x4   :  { %p135_p0 = scmp.ne.s32.totalorder %s15_s7, %s134_s8  ;;  %p140_p2 = scmp.lt.s32.totalorder %s134_s8, %s134_s8 }
   0x6   :  { %p141_p3 = por %p140_p2, %p139_p1 }
   0x8   :  { %p142_p4 = pnand %p141_p3, %p135_p0 }
   0xa   :  { %145 = shalt.err (!%p142_p4)
}
   0xb   :  { %17 = dma.hbm_to_vmem [thread:$0]  %s204_s0, 256, %s15_s7, [#allocation3]  }
   0xc   :  { %166 = dma.done.wait [#allocation3], 256  }
   0xd   :  { %167 = vsyncadd [#allocation3], 4294967040  ;;  %v21_v0 = vld [vmem:[#allocation2] sm:$0xff]  ;;  %v22_v1 = vld [vmem:[#allocation2 + $0x8] sm:$0xff]  ;;  %s171_s0 = smov [#allocation5]  }
   0xe   :  { %v104_v2 = vadd.f32 50.0, %v21_v0  ;;  %v106_v3 = vadd.f32 -50.0, %v21_v0  ;;  %v185_v4 = vadd.f32 50.0, %v22_v1  ;;  %v187_v5 = vadd.f32 -50.0, %v22_v1  ;;  %s95_s11 = sshll.u32 %s171_s0, 4  ;;  %s96_s11 = int_to_ptr.vmem [resolvable:$true] %s95_s11 }
   0xf   :  { %s146_s12 = scalar_lea.vmem %s96_s11, 256  ;;  %p151_p6 = scmp.lt.s32.totalorder %s96_s11, %s96_s11 }
  0x10   :  { %v25_v6 = vmin.f32 %v104_v2, 20.0  ;;  %v55_v7 = vmin.f32 %v106_v3, 20.0  ;;  %v26_v8 = vmin.f32 %v185_v4, 20.0  ;;  %v56_v9 = vmin.f32 %v187_v5, 20.0  ;;  %p147_p5 = scmp.ne.s32.totalorder %s96_s11, %s146_s12  ;;  %p152_p7 = scmp.lt.s32.totalorder %s146_s12, %s146_s12 }
  0x11   :  { %vm49_vm1 = vcmp.gt.f32.partialorder %v104_v2, 20.0  ;;  %vm79_vm3 = vcmp.gt.f32.partialorder %v106_v3, 20.0  ;;  %vm50_vm5 = vcmp.gt.f32.partialorder %v185_v4, 20.0  ;;  %vm80_vm7 = vcmp.gt.f32.partialorder %v187_v5, 20.0 }
  0x12   :  { %v27_v10 = vmul.f32 1.442695, %v25_v6  ;;  %v57_v11 = vmul.f32 1.442695, %v55_v7  ;;  %v29_v12 = vmul.f32 1.442695, %v26_v8  ;;  %p153_p8 = por %p152_p7, %p151_p6 }
  0x13   :  { %v59_v13 = vmul.f32 1.442695, %v56_v9 }
  0x14   :  { %110 = vpow2.f32 %v27_v10  ;;  %p154_p9 = pnand %p153_p8, %p147_p5 }
  0x15   :  { %112 = vpow2.f32 %v57_v11 }
  0x16   :  { %114 = vpow2.f32 %v29_v12 }
  0x17   :  { %116 = vpow2.f32 %v59_v13 }
  0x21   :  { %v111_v14 = vpop.eup %110 }
  0x22   :  { %v113_v15 = vpop.eup %112  ;;  %v31_v16 = vadd.f32 1.0, %v111_v14  ;;  %v34_v22 = vmul.f32 -0.5, %v111_v14  ;;  %v37_v27 = vand.u32 2147483647, %v111_v14 }
  0x23   :  { %v115_v17 = vpop.eup %114  ;;  %v61_v18 = vadd.f32 1.0, %v113_v15  ;;  %v64_v23 = vmul.f32 -0.5, %v113_v15  ;;  %v67_v29 = vand.u32 2147483647, %v113_v15 }
  0x24   :  { %v117_v19 = vpop.eup %116  ;;  %118 = vlog2.f32 %v31_v16  ;;  %v40_v20 = vadd.f32 1.0, %v115_v17  ;;  %v43_v24 = vmul.f32 -0.5, %v115_v17  ;;  %v35_v25 = vadd.f32 1.0, %v34_v22 }
  0x25   :  { %120 = vlog2.f32 %v61_v18  ;;  %v70_v21 = vadd.f32 1.0, %v117_v19  ;;  %v73_v26 = vmul.f32 -0.5, %v117_v19  ;;  %v65_v28 = vadd.f32 1.0, %v64_v23 }
  0x26   :  { %122 = vlog2.f32 %v40_v20  ;;  %v44_v30 = vadd.f32 1.0, %v43_v24  ;;  %v46_v31 = vand.u32 2147483647, %v115_v17  ;;  %v36_v32 = vmul.f32 %v111_v14, %v35_v25 }
  0x27   :  { %124 = vlog2.f32 %v70_v21  ;;  %v74_v33 = vadd.f32 1.0, %v73_v26  ;;  %vm191_vm0 = vcmp.lt.f32.partialorder %v37_v27, 0.0004427343  ;;  %v66_v36 = vmul.f32 %v113_v15, %v65_v28 }
  0x28   :  { %v76_v37 = vand.u32 2147483647, %v117_v19  ;;  %vm68_vm2 = vcmp.lt.f32.partialorder %v67_v29, 0.0004427343  ;;  %v45_v40 = vmul.f32 %v115_v17, %v44_v30  ;;  %vm47_vm4 = vcmp.lt.f32.partialorder %v46_v31, 0.0004427343 }
  0x29   :  { %v75_v45 = vmul.f32 %v117_v19, %v74_v33 }
  0x2a   :  { %vm77_vm6 = vcmp.lt.f32.partialorder %v76_v37, 0.0004427343 }
  0x31   :  { %v119_v34 = vpop.eup %118 }
  0x32   :  { %v121_v38 = vpop.eup %120  ;;  %v33_v39 = vmul.f32 0.6931472, %v119_v34 }
  0x33   :  { %v123_v41 = vpop.eup %122  ;;  %v63_v42 = vmul.f32 0.6931472, %v121_v38 }
  0x34   :  { %v39_v43 = vsel %vm191_vm0, %v36_v32, %v33_v39  ;;  %v42_v44 = vmul.f32 0.6931472, %v123_v41  ;;  %v125_v46 = vpop.eup %124 }
  0x35   :  { %v51_v47 = vsel %vm49_vm1, %v104_v2, %v39_v43  ;;  %v69_v48 = vsel %vm68_vm2, %v66_v36, %v63_v42  ;;  %v72_v51 = vmul.f32 0.6931472, %v125_v46 }
  0x36   :  { %v81_v49 = vsel %vm79_vm3, %v106_v3, %v69_v48  ;;  %v48_v50 = vsel %vm47_vm4, %v45_v40, %v42_v44 }
  0x37   :  { %v83_v52 = vsub.f32 %v51_v47, %v81_v49  ;;  %v52_v53 = vsel %vm50_vm5, %v185_v4, %v48_v50  ;;  %v78_v54 = vsel %vm77_vm6, %v75_v45, %v72_v51 }
  0x38   :  { %v82_v56 = vsel %vm80_vm7, %v187_v5, %v78_v54 }
  0x39   :  { %v85_v55 = vadd.f32 -50.0, %v83_v52  ;;  %v84_v57 = vsub.f32 %v52_v53, %v82_v56 }
  0x3b   :  { %87 = vst [vmem:[#allocation5] sm:$0xff] %v85_v55  ;;  %v86_v58 = vadd.f32 -50.0, %v84_v57 }
  0x3d   :  { %88 = vst [vmem:[#allocation5 + $0x8] sm:$0xff] %v86_v58 }
  0x3e   :  { %157 = shalt.err (!%p154_p9)
}
  0x3f   :  { %98 = dma.vmem_to_hbm [thread:$0]  %s96_s11, 256, %s205_s1, [#allocation4]  }
  0x40   :  { %168 = dma.done.wait [#allocation4], 256  }
  0x41   :  { %169 = vsyncadd [#allocation4], 4294967040 }
  0x42   :  { %102 = vsyncpa [#allocation3], 1 }
  0x43   :  { %103 = vsyncpa [#allocation4], 1 }

</bundles_post_ra>
